<compile_context>
chip_gen: v7x
topology: tpu7x:2x2x1
jax: 0.10.0
libtpu: 0.0.40
codegen_flags: <defaults>
</compile_context>

<pallas_src>
import jax
import jax.numpy as jnp
from jax import lax
from jax.experimental import pallas as pl
from jax.experimental.pallas import tpu as pltpu


def _decoder_kernel(x_ref, h0_ref, c0_ref,
                    w_ih_t_ref, w_hh_t_ref, b_ref,
                    w_out_t_ref, b_out_ref,
                    y_ref, hN_ref, cN_ref,
                    gin_scr, hs_scr):
    # Shapes (all 2-D, time-major, batch padded to BP rows):
    #   x_ref:      (T*BP, D_in)      gin_scr: (T*BP, 4H)
    #   h0/c0:      (BP, H)           hs_scr:  (T*BP, H)
    #   y_ref:      (T*BP, D_out)     hN/cN:   (BP, H)
    BP, H = h0_ref.shape
    T = x_ref.shape[0] // BP

    # (1) Batched input projection: one MXU call (no recurrent dependency).
    gin_scr[...] = (jnp.dot(x_ref[...], w_ih_t_ref[...],
                            preferred_element_type=jnp.float32)
                    + b_ref[...])

    w_hh_t = w_hh_t_ref[...]          # (H, 4H), loaded once

    # (2) Serial recurrence: exactly one small matmul per step on the critical
    #     path; h/c are loop carries (no scratch state, no redundant stores).
    def step(t, carry):
        h_prev, c_prev = carry
        r0 = pl.multiple_of(t * BP, BP)            # 8-aligned row offset
        gates = gin_scr[pl.ds(r0, BP), :] + jnp.dot(
            h_prev, w_hh_t, preferred_element_type=jnp.float32)
        # PyTorch gate order: i, f, g, o
        i_g = jax.nn.sigmoid(gates[:, 0 * H:1 * H])
        f_g = jax.nn.sigmoid(gates[:, 1 * H:2 * H])
        g_g = jnp.tanh(gates[:, 2 * H:3 * H])
        o_g = jax.nn.sigmoid(gates[:, 3 * H:4 * H])
        c_new = f_g * c_prev + i_g * g_g
        h_new = o_g * jnp.tanh(c_new)
        hs_scr[pl.ds(r0, BP), :] = h_new
        return (h_new, c_new)

    h_fin, c_fin = lax.fori_loop(0, T, step,
                                 (h0_ref[...], c0_ref[...]),
                                 unroll=True)

    hN_ref[...] = h_fin
    cN_ref[...] = c_fin

    # (3) Batched output projection after the loop: single GEMM, single store.
    y_ref[...] = (jnp.dot(hs_scr[...], w_out_t_ref[...],
                          preferred_element_type=jnp.float32)
                  + b_out_ref[...])


def decoder_forward(x, hidden, params):
    """x: (B, T, D_in) f32, hidden: (h0, c0) each (1, B, H).
    Returns (output (B, T, D_out), (h_n, c_n) each (1, B, H))."""
    h0, c0 = hidden
    B, T, D_in = x.shape
    H = h0.shape[-1]
    D_out = params["w_out"].shape[0]

    BP = max(8, ((B + 7) // 8) * 8)     # pad batch to a sublane multiple

    # Time-major, batch-padded, flattened to a single 2-D slab for the kernel.
    x_tm = jnp.transpose(x, (1, 0, 2))                                # (T, B, D_in)
    x_p = jnp.zeros((T, BP, D_in), jnp.float32).at[:, :B].set(x_tm)
    x2d = x_p.reshape(T * BP, D_in)

    h0_p = jnp.zeros((BP, H), jnp.float32).at[:B].set(h0[0])
    c0_p = jnp.zeros((BP, H), jnp.float32).at[:B].set(c0[0])

    w_ih_t = params["w_ih"].T                                         # (D_in, 4H)
    w_hh_t = params["w_hh"].T                                         # (H, 4H)
    b = (params["b_ih"] + params["b_hh"]).reshape(1, 4 * H)
    w_out_t = params["w_out"].T                                       # (H, D_out)
    b_out = params["b_out"].reshape(1, D_out)

    # Single kernel invocation: every array fits trivially in VMEM, so no grid
    # and no auto-pipelining (this removes all per-step grid overhead).
    y2d, h_n, c_n = pl.pallas_call(
        _decoder_kernel,
        out_shape=(
            jax.ShapeDtypeStruct((T * BP, D_out), jnp.float32),
            jax.ShapeDtypeStruct((BP, H), jnp.float32),
            jax.ShapeDtypeStruct((BP, H), jnp.float32),
        ),
        scratch_shapes=[
            pltpu.VMEM((T * BP, 4 * H), jnp.float32),   # precomputed input gates
            pltpu.VMEM((T * BP, H), jnp.float32),       # per-step hidden states
        ],
    )(x2d, h0_p, c0_p, w_ih_t, w_hh_t, b, w_out_t, b_out)

    y = jnp.transpose(y2d.reshape(T, BP, D_out)[:, :B], (1, 0, 2))    # (B, T, D_out)
    return y, (h_n[:B][None], c_n[:B][None])


def _reference_forward(x, hidden, params):
    """Pure-JAX reference matching torch.nn.LSTM(batch_first) + Linear."""
    h0, c0 = hidden
    w_ih, w_hh = params["w_ih"], params["w_hh"]
    b = params["b_ih"] + params["b_hh"]
    H = h0.shape[-1]

    def step(carry, x_t):
        h, c = carry
        gates = x_t @ w_ih.T + h @ w_hh.T + b
        i = jax.nn.sigmoid(gates[:, 0 * H:1 * H])
        f = jax.nn.sigmoid(gates[:, 1 * H:2 * H])
        g = jnp.tanh(gates[:, 2 * H:3 * H])
        o = jax.nn.sigmoid(gates[:, 3 * H:4 * H])
        c = f * c + i * g
        h = o * jnp.tanh(c)
        return (h, c), h

    (h_n, c_n), hs = lax.scan(step, (h0[0], c0[0]), jnp.transpose(x, (1, 0, 2)))
    lstm_out = jnp.transpose(hs, (1, 0, 2))
    y = lstm_out @ params["w_out"].T + params["b_out"]
    return y, (h_n[None], c_n[None])


def init_params(key, output_dim, hidden_dim):
    ks = jax.random.split(key, 6)
    bound = 1.0 / jnp.sqrt(hidden_dim)
    u = lambda k, shape: jax.random.uniform(k, shape, jnp.float32, -bound, bound)
    return {
        "w_ih": u(ks[0], (4 * hidden_dim, output_dim)),
        "w_hh": u(ks[1], (4 * hidden_dim, hidden_dim)),
        "b_ih": u(ks[2], (4 * hidden_dim,)),
        "b_hh": u(ks[3], (4 * hidden_dim,)),
        "w_out": u(ks[4], (output_dim, hidden_dim)),
        "b_out": u(ks[5], (output_dim,)),
    }


if __name__ == "__main__":
    B, T, D_out_dim, H = 2, 8, 4, 32   # batch, seq, output_dim, hidden_dim

    key = jax.random.PRNGKey(0)
    k_p, k_x, k_h, k_c = jax.random.split(key, 4)

    params = init_params(k_p, D_out_dim, H)
    x = jax.random.normal(k_x, (B, T, D_out_dim), jnp.float32)
    h0 = jax.random.normal(k_h, (1, B, H), jnp.float32)
    c0 = jax.random.normal(k_c, (1, B, H), jnp.float32)

    y, (h_n, c_n) = decoder_forward(x, (h0, c0), params)
    jax.block_until_ready((y, h_n, c_n))

    y_ref, (h_ref, c_ref) = _reference_forward(x, (h0, c0), params)
    assert jnp.allclose(y, y_ref, rtol=1e-4, atol=1e-4)
    assert jnp.allclose(h_n, h_ref, rtol=1e-4, atol=1e-4)
    assert jnp.allclose(c_n, c_ref, rtol=1e-4, atol=1e-4)

    print("KERNEL_OK")
</pallas_src>

<mosaic_0001>
module attributes {stable_mosaic.version = 11 : i64} {
  func.func @_decoder_kernel(%arg0: memref<64x4xf32, #tpu.memory_space<vmem>>, %arg1: memref<8x32xf32, #tpu.memory_space<vmem>>, %arg2: memref<8x32xf32, #tpu.memory_space<vmem>>, %arg3: memref<4x128xf32, #tpu.memory_space<vmem>>, %arg4: memref<32x128xf32, #tpu.memory_space<vmem>>, %arg5: memref<1x128xf32, #tpu.memory_space<vmem>>, %arg6: memref<32x4xf32, #tpu.memory_space<vmem>>, %arg7: memref<1x4xf32, #tpu.memory_space<vmem>>, %arg8: memref<64x4xf32, #tpu.memory_space<vmem>>, %arg9: memref<8x32xf32, #tpu.memory_space<vmem>>, %arg10: memref<8x32xf32, #tpu.memory_space<vmem>>, %arg11: memref<64x128xf32, #tpu.memory_space<vmem>>, %arg12: memref<64x32xf32, #tpu.memory_space<vmem>>) attributes {dimension_semantics = [], scalar_prefetch = 0 : i64, scratch_operands = 2 : i64, tpu.core_type = #tpu.core_type<tc>} {
    %c0 = arith.constant 0 : index
    %c0_0 = arith.constant 0 : index
    %0 = vector.load %arg0[%c0, %c0_0] : memref<64x4xf32, #tpu.memory_space<vmem>>, vector<64x4xf32>
    %c0_1 = arith.constant 0 : index
    %c0_2 = arith.constant 0 : index
    %1 = vector.load %arg3[%c0_1, %c0_2] : memref<4x128xf32, #tpu.memory_space<vmem>>, vector<4x128xf32>
    %cst = arith.constant dense<0.000000e+00> : vector<64x128xf32>
    %2 = tpu.matmul %0, %1, %cst {dimension_numbers = #tpu.dot_dimension_numbers<[1], [0], [0], [1], [0, 0, 1, 1], [], []>} : vector<64x4xf32>, vector<4x128xf32>, vector<64x128xf32> -> vector<64x128xf32>
    %c0_3 = arith.constant 0 : index
    %c0_4 = arith.constant 0 : index
    %3 = vector.load %arg5[%c0_3, %c0_4] : memref<1x128xf32, #tpu.memory_space<vmem>>, vector<1x128xf32>
    %4 = vector.broadcast %3 : vector<1x128xf32> to vector<64x128xf32>
    %5 = arith.addf %2, %4 : vector<64x128xf32>
    %c0_5 = arith.constant 0 : index
    %c0_6 = arith.constant 0 : index
    %6 = vector.load %arg11[%c0_5, %c0_6] : memref<64x128xf32, #tpu.memory_space<vmem>>, vector<64x128xf32>
    tpu.vector_store %arg11[%c0_5, %c0_6], %5 {strides = array<i32>} : memref<64x128xf32, #tpu.memory_space<vmem>>, vector<64x128xf32>,
    %c0_7 = arith.constant 0 : index
    %c0_8 = arith.constant 0 : index
    %7 = vector.load %arg4[%c0_7, %c0_8] : memref<32x128xf32, #tpu.memory_space<vmem>>, vector<32x128xf32>
    %c0_9 = arith.constant 0 : index
    %c0_10 = arith.constant 0 : index
    %8 = vector.load %arg1[%c0_9, %c0_10] : memref<8x32xf32, #tpu.memory_space<vmem>>, vector<8x32xf32>
    %c0_11 = arith.constant 0 : index
    %c0_12 = arith.constant 0 : index
    %9 = vector.load %arg2[%c0_11, %c0_12] : memref<8x32xf32, #tpu.memory_space<vmem>>, vector<8x32xf32>
    %c0_i32 = arith.constant 0 : i32
    %c8_i32 = arith.constant 8 : i32
    %10 = arith.muli %c0_i32, %c8_i32 : i32
    %11 = tpu.assume_multiple %10, 8 : i32
    %12 = arith.index_cast %11 : i32 to index
    %c0_13 = arith.constant 0 : index
    %13 = vector.load %arg11[%12, %c0_13] : memref<64x128xf32, #tpu.memory_space<vmem>>, vector<8x128xf32>
    %cst_14 = arith.constant dense<0.000000e+00> : vector<8x128xf32>
    %14 = tpu.matmul %8, %7, %cst_14 {dimension_numbers = #tpu.dot_dimension_numbers<[1], [0], [0], [1], [0, 0, 1, 1], [], []>} : vector<8x32xf32>, vector<32x128xf32>, vector<8x128xf32> -> vector<8x128xf32>
    %15 = arith.addf %13, %14 : vector<8x128xf32>
    %16 = vector.extract_strided_slice %15 {offsets = [0, 0], sizes = [8, 32], strides = [1, 1]} : vector<8x128xf32> to vector<8x32xf32>
    %17 = arith.negf %16 : vector<8x32xf32>
    %18 = math.exp %17 : vector<8x32xf32>
    %cst_15 = arith.constant 1.000000e+00 : f32
    %19 = vector.broadcast %cst_15 : f32 to vector<8x32xf32>
    %20 = arith.addf %19, %18 : vector<8x32xf32>
    %21 = arith.divf %19, %20 : vector<8x32xf32>
    %22 = vector.extract_strided_slice %15 {offsets = [0, 32], sizes = [8, 32], strides = [1, 1]} : vector<8x128xf32> to vector<8x32xf32>
    %23 = arith.negf %22 : vector<8x32xf32>
    %24 = math.exp %23 : vector<8x32xf32>
    %cst_16 = arith.constant 1.000000e+00 : f32
    %25 = vector.broadcast %cst_16 : f32 to vector<8x32xf32>
    %26 = arith.addf %25, %24 : vector<8x32xf32>
    %27 = arith.divf %25, %26 : vector<8x32xf32>
    %28 = vector.extract_strided_slice %15 {offsets = [0, 64], sizes = [8, 32], strides = [1, 1]} : vector<8x128xf32> to vector<8x32xf32>
    %29 = math.tanh %28 : vector<8x32xf32>
    %30 = vector.extract_strided_slice %15 {offsets = [0, 96], sizes = [8, 32], strides = [1, 1]} : vector<8x128xf32> to vector<8x32xf32>
    %31 = arith.negf %30 : vector<8x32xf32>
    %32 = math.exp %31 : vector<8x32xf32>
    %cst_17 = arith.constant 1.000000e+00 : f32
    %33 = vector.broadcast %cst_17 : f32 to vector<8x32xf32>
    %34 = arith.addf %33, %32 : vector<8x32xf32>
    %35 = arith.divf %33, %34 : vector<8x32xf32>
    %36 = arith.mulf %27, %9 : vector<8x32xf32>
    %37 = arith.mulf %21, %29 : vector<8x32xf32>
    %38 = arith.addf %36, %37 : vector<8x32xf32>
    %39 = math.tanh %38 : vector<8x32xf32>
    %40 = arith.mulf %35, %39 : vector<8x32xf32>
    %41 = arith.index_cast %11 : i32 to index
    %c0_18 = arith.constant 0 : index
    %42 = vector.load %arg12[%41, %c0_18] : memref<64x32xf32, #tpu.memory_space<vmem>>, vector<8x32xf32>
    tpu.vector_store %arg12[%41, %c0_18], %40 {strides = array<i32>} : memref<64x32xf32, #tpu.memory_space<vmem>>, vector<8x32xf32>,
    %c1_i32 = arith.constant 1 : i32
    %c8_i32_19 = arith.constant 8 : i32
    %43 = arith.muli %c1_i32, %c8_i32_19 : i32
    %44 = tpu.assume_multiple %43, 8 : i32
    %45 = arith.index_cast %44 : i32 to index
    %c0_20 = arith.constant 0 : index
    %46 = vector.load %arg11[%45, %c0_20] : memref<64x128xf32, #tpu.memory_space<vmem>>, vector<8x128xf32>
    %cst_21 = arith.constant dense<0.000000e+00> : vector<8x128xf32>
    %47 = tpu.matmul %40, %7, %cst_21 {dimension_numbers = #tpu.dot_dimension_numbers<[1], [0], [0], [1], [0, 0, 1, 1], [], []>} : vector<8x32xf32>, vector<32x128xf32>, vector<8x128xf32> -> vector<8x128xf32>
    %48 = arith.addf %46, %47 : vector<8x128xf32>
    %49 = vector.extract_strided_slice %48 {offsets = [0, 0], sizes = [8, 32], strides = [1, 1]} : vector<8x128xf32> to vector<8x32xf32>
    %50 = arith.negf %49 : vector<8x32xf32>
    %51 = math.exp %50 : vector<8x32xf32>
    %cst_22 = arith.constant 1.000000e+00 : f32
    %52 = vector.broadcast %cst_22 : f32 to vector<8x32xf32>
    %53 = arith.addf %52, %51 : vector<8x32xf32>
    %54 = arith.divf %52, %53 : vector<8x32xf32>
    %55 = vector.extract_strided_slice %48 {offsets = [0, 32], sizes = [8, 32], strides = [1, 1]} : vector<8x128xf32> to vector<8x32xf32>
    %56 = arith.negf %55 : vector<8x32xf32>
    %57 = math.exp %56 : vector<8x32xf32>
    %cst_23 = arith.constant 1.000000e+00 : f32
    %58 = vector.broadcast %cst_23 : f32 to vector<8x32xf32>
    %59 = arith.addf %58, %57 : vector<8x32xf32>
    %60 = arith.divf %58, %59 : vector<8x32xf32>
    %61 = vector.extract_strided_slice %48 {offsets = [0, 64], sizes = [8, 32], strides = [1, 1]} : vector<8x128xf32> to vector<8x32xf32>
    %62 = math.tanh %61 : vector<8x32xf32>
    %63 = vector.extract_strided_slice %48 {offsets = [0, 96], sizes = [8, 32], strides = [1, 1]} : vector<8x128xf32> to vector<8x32xf32>
    %64 = arith.negf %63 : vector<8x32xf32>
    %65 = math.exp %64 : vector<8x32xf32>
    %cst_24 = arith.constant 1.000000e+00 : f32
    %66 = vector.broadcast %cst_24 : f32 to vector<8x32xf32>
    %67 = arith.addf %66, %65 : vector<8x32xf32>
    %68 = arith.divf %66, %67 : vector<8x32xf32>
    %69 = arith.mulf %60, %38 : vector<8x32xf32>
    %70 = arith.mulf %54, %62 : vector<8x32xf32>
    %71 = arith.addf %69, %70 : vector<8x32xf32>
    %72 = math.tanh %71 : vector<8x32xf32>
    %73 = arith.mulf %68, %72 : vector<8x32xf32>
    %74 = arith.index_cast %44 : i32 to index
    %c0_25 = arith.constant 0 : index
    %75 = vector.load %arg12[%74, %c0_25] : memref<64x32xf32, #tpu.memory_space<vmem>>, vector<8x32xf32>
    tpu.vector_store %arg12[%74, %c0_25], %73 {strides = array<i32>} : memref<64x32xf32, #tpu.memory_space<vmem>>, vector<8x32xf32>,
    %c2_i32 = arith.constant 2 : i32
    %c8_i32_26 = arith.constant 8 : i32
    %76 = arith.muli %c2_i32, %c8_i32_26 : i32
    %77 = tpu.assume_multiple %76, 8 : i32
    %78 = arith.index_cast %77 : i32 to index
    %c0_27 = arith.constant 0 : index
    %79 = vector.load %arg11[%78, %c0_27] : memref<64x128xf32, #tpu.memory_space<vmem>>, vector<8x128xf32>
    %cst_28 = arith.constant dense<0.000000e+00> : vector<8x128xf32>
    %80 = tpu.matmul %73, %7, %cst_28 {dimension_numbers = #tpu.dot_dimension_numbers<[1], [0], [0], [1], [0, 0, 1, 1], [], []>} : vector<8x32xf32>, vector<32x128xf32>, vector<8x128xf32> -> vector<8x128xf32>
    %81 = arith.addf %79, %80 : vector<8x128xf32>
    %82 = vector.extract_strided_slice %81 {offsets = [0, 0], sizes = [8, 32], strides = [1, 1]} : vector<8x128xf32> to vector<8x32xf32>
    %83 = arith.negf %82 : vector<8x32xf32>
    %84 = math.exp %83 : vector<8x32xf32>
    %cst_29 = arith.constant 1.000000e+00 : f32
    %85 = vector.broadcast %cst_29 : f32 to vector<8x32xf32>
    %86 = arith.addf %85, %84 : vector<8x32xf32>
    %87 = arith.divf %85, %86 : vector<8x32xf32>
    %88 = vector.extract_strided_slice %81 {offsets = [0, 32], sizes = [8, 32], strides = [1, 1]} : vector<8x128xf32> to vector<8x32xf32>
    %89 = arith.negf %88 : vector<8x32xf32>
    %90 = math.exp %89 : vector<8x32xf32>
    %cst_30 = arith.constant 1.000000e+00 : f32
    %91 = vector.broadcast %cst_30 : f32 to vector<8x32xf32>
    %92 = arith.addf %91, %90 : vector<8x32xf32>
    %93 = arith.divf %91, %92 : vector<8x32xf32>
    %94 = vector.extract_strided_slice %81 {offsets = [0, 64], sizes = [8, 32], strides = [1, 1]} : vector<8x128xf32> to vector<8x32xf32>
    %95 = math.tanh %94 : vector<8x32xf32>
    %96 = vector.extract_strided_slice %81 {offsets = [0, 96], sizes = [8, 32], strides = [1, 1]} : vector<8x128xf32> to vector<8x32xf32>
    %97 = arith.negf %96 : vector<8x32xf32>
    %98 = math.exp %97 : vector<8x32xf32>
    %cst_31 = arith.constant 1.000000e+00 : f32
    %99 = vector.broadcast %cst_31 : f32 to vector<8x32xf32>
    %100 = arith.addf %99, %98 : vector<8x32xf32>
    %101 = arith.divf %99, %100 : vector<8x32xf32>
    %102 = arith.mulf %93, %71 : vector<8x32xf32>
    %103 = arith.mulf %87, %95 : vector<8x32xf32>
    %104 = arith.addf %102, %103 : vector<8x32xf32>
    %105 = math.tanh %104 : vector<8x32xf32>
    %106 = arith.mulf %101, %105 : vector<8x32xf32>
    %107 = arith.index_cast %77 : i32 to index
    %c0_32 = arith.constant 0 : index
    %108 = vector.load %arg12[%107, %c0_32] : memref<64x32xf32, #tpu.memory_space<vmem>>, vector<8x32xf32>
    tpu.vector_store %arg12[%107, %c0_32], %106 {strides = array<i32>} : memref<64x32xf32, #tpu.memory_space<vmem>>, vector<8x32xf32>,
    %c3_i32 = arith.constant 3 : i32
    %c8_i32_33 = arith.constant 8 : i32
    %109 = arith.muli %c3_i32, %c8_i32_33 : i32
    %110 = tpu.assume_multiple %109, 8 : i32
    %111 = arith.index_cast %110 : i32 to index
    %c0_34 = arith.constant 0 : index
    %112 = vector.load %arg11[%111, %c0_34] : memref<64x128xf32, #tpu.memory_space<vmem>>, vector<8x128xf32>
    %cst_35 = arith.constant dense<0.000000e+00> : vector<8x128xf32>
    %113 = tpu.matmul %106, %7, %cst_35 {dimension_numbers = #tpu.dot_dimension_numbers<[1], [0], [0], [1], [0, 0, 1, 1], [], []>} : vector<8x32xf32>, vector<32x128xf32>, vector<8x128xf32> -> vector<8x128xf32>
    %114 = arith.addf %112, %113 : vector<8x128xf32>
    %115 = vector.extract_strided_slice %114 {offsets = [0, 0], sizes = [8, 32], strides = [1, 1]} : vector<8x128xf32> to vector<8x32xf32>
    %116 = arith.negf %115 : vector<8x32xf32>
    %117 = math.exp %116 : vector<8x32xf32>
    %cst_36 = arith.constant 1.000000e+00 : f32
    %118 = vector.broadcast %cst_36 : f32 to vector<8x32xf32>
    %119 = arith.addf %118, %117 : vector<8x32xf32>
    %120 = arith.divf %118, %119 : vector<8x32xf32>
    %121 = vector.extract_strided_slice %114 {offsets = [0, 32], sizes = [8, 32], strides = [1, 1]} : vector<8x128xf32> to vector<8x32xf32>
    %122 = arith.negf %121 : vector<8x32xf32>
    %123 = math.exp %122 : vector<8x32xf32>
    %cst_37 = arith.constant 1.000000e+00 : f32
    %124 = vector.broadcast %cst_37 : f32 to vector<8x32xf32>
    %125 = arith.addf %124, %123 : vector<8x32xf32>
    %126 = arith.divf %124, %125 : vector<8x32xf32>
    %127 = vector.extract_strided_slice %114 {offsets = [0, 64], sizes = [8, 32], strides = [1, 1]} : vector<8x128xf32> to vector<8x32xf32>
    %128 = math.tanh %127 : vector<8x32xf32>
    %129 = vector.extract_strided_slice %114 {offsets = [0, 96], sizes = [8, 32], strides = [1, 1]} : vector<8x128xf32> to vector<8x32xf32>
    %130 = arith.negf %129 : vector<8x32xf32>
    %131 = math.exp %130 : vector<8x32xf32>
    %cst_38 = arith.constant 1.000000e+00 : f32
    %132 = vector.broadcast %cst_38 : f32 to vector<8x32xf32>
    %133 = arith.addf %132, %131 : vector<8x32xf32>
    %134 = arith.divf %132, %133 : vector<8x32xf32>
    %135 = arith.mulf %126, %104 : vector<8x32xf32>
    %136 = arith.mulf %120, %128 : vector<8x32xf32>
    %137 = arith.addf %135, %136 : vector<8x32xf32>
    %138 = math.tanh %137 : vector<8x32xf32>
    %139 = arith.mulf %134, %138 : vector<8x32xf32>
    %140 = arith.index_cast %110 : i32 to index
    %c0_39 = arith.constant 0 : index
    %141 = vector.load %arg12[%140, %c0_39] : memref<64x32xf32, #tpu.memory_space<vmem>>, vector<8x32xf32>
    tpu.vector_store %arg12[%140, %c0_39], %139 {strides = array<i32>} : memref<64x32xf32, #tpu.memory_space<vmem>>, vector<8x32xf32>,
    %c4_i32 = arith.constant 4 : i32
    %c8_i32_40 = arith.constant 8 : i32
    %142 = arith.muli %c4_i32, %c8_i32_40 : i32
    %143 = tpu.assume_multiple %142, 8 : i32
    %144 = arith.index_cast %143 : i32 to index
    %c0_41 = arith.constant 0 : index
    %145 = vector.load %arg11[%144, %c0_41] : memref<64x128xf32, #tpu.memory_space<vmem>>, vector<8x128xf32>
    %cst_42 = arith.constant dense<0.000000e+00> : vector<8x128xf32>
    %146 = tpu.matmul %139, %7, %cst_42 {dimension_numbers = #tpu.dot_dimension_numbers<[1], [0], [0], [1], [0, 0, 1, 1], [], []>} : vector<8x32xf32>, vector<32x128xf32>, vector<8x128xf32> -> vector<8x128xf32>
    %147 = arith.addf %145, %146 : vector<8x128xf32>
    %148 = vector.extract_strided_slice %147 {offsets = [0, 0], sizes = [8, 32], strides = [1, 1]} : vector<8x128xf32> to vector<8x32xf32>
    %149 = arith.negf %148 : vector<8x32xf32>
    %150 = math.exp %149 : vector<8x32xf32>
    %cst_43 = arith.constant 1.000000e+00 : f32
    %151 = vector.broadcast %cst_43 : f32 to vector<8x32xf32>
    %152 = arith.addf %151, %150 : vector<8x32xf32>
    %153 = arith.divf %151, %152 : vector<8x32xf32>
    %154 = vector.extract_strided_slice %147 {offsets = [0, 32], sizes = [8, 32], strides = [1, 1]} : vector<8x128xf32> to vector<8x32xf32>
    %155 = arith.negf %154 : vector<8x32xf32>
    %156 = math.exp %155 : vector<8x32xf32>
    %cst_44 = arith.constant 1.000000e+00 : f32
    %157 = vector.broadcast %cst_44 : f32 to vector<8x32xf32>
    %158 = arith.addf %157, %156 : vector<8x32xf32>
    %159 = arith.divf %157, %158 : vector<8x32xf32>
    %160 = vector.extract_strided_slice %147 {offsets = [0, 64], sizes = [8, 32], strides = [1, 1]} : vector<8x128xf32> to vector<8x32xf32>
    %161 = math.tanh %160 : vector<8x32xf32>
    %162 = vector.extract_strided_slice %147 {offsets = [0, 96], sizes = [8, 32], strides = [1, 1]} : vector<8x128xf32> to vector<8x32xf32>
    %163 = arith.negf %162 : vector<8x32xf32>
    %164 = math.exp %163 : vector<8x32xf32>
    %cst_45 = arith.constant 1.000000e+00 : f32
    %165 = vector.broadcast %cst_45 : f32 to vector<8x32xf32>
    %166 = arith.addf %165, %164 : vector<8x32xf32>
    %167 = arith.divf %165, %166 : vector<8x32xf32>
    %168 = arith.mulf %159, %137 : vector<8x32xf32>
    %169 = arith.mulf %153, %161 : vector<8x32xf32>
    %170 = arith.addf %168, %169 : vector<8x32xf32>
    %171 = math.tanh %170 : vector<8x32xf32>
    %172 = arith.mulf %167, %171 : vector<8x32xf32>
    %173 = arith.index_cast %143 : i32 to index
    %c0_46 = arith.constant 0 : index
    %174 = vector.load %arg12[%173, %c0_46] : memref<64x32xf32, #tpu.memory_space<vmem>>, vector<8x32xf32>
    tpu.vector_store %arg12[%173, %c0_46], %172 {strides = array<i32>} : memref<64x32xf32, #tpu.memory_space<vmem>>, vector<8x32xf32>,
    %c5_i32 = arith.constant 5 : i32
    %c8_i32_47 = arith.constant 8 : i32
    %175 = arith.muli %c5_i32, %c8_i32_47 : i32
    %176 = tpu.assume_multiple %175, 8 : i32
    %177 = arith.index_cast %176 : i32 to index
    %c0_48 = arith.constant 0 : index
    %178 = vector.load %arg11[%177, %c0_48] : memref<64x128xf32, #tpu.memory_space<vmem>>, vector<8x128xf32>
    %cst_49 = arith.constant dense<0.000000e+00> : vector<8x128xf32>
    %179 = tpu.matmul %172, %7, %cst_49 {dimension_numbers = #tpu.dot_dimension_numbers<[1], [0], [0], [1], [0, 0, 1, 1], [], []>} : vector<8x32xf32>, vector<32x128xf32>, vector<8x128xf32> -> vector<8x128xf32>
    %180 = arith.addf %178, %179 : vector<8x128xf32>
    %181 = vector.extract_strided_slice %180 {offsets = [0, 0], sizes = [8, 32], strides = [1, 1]} : vector<8x128xf32> to vector<8x32xf32>
    %182 = arith.negf %181 : vector<8x32xf32>
    %183 = math.exp %182 : vector<8x32xf32>
    %cst_50 = arith.constant 1.000000e+00 : f32
    %184 = vector.broadcast %cst_50 : f32 to vector<8x32xf32>
    %185 = arith.addf %184, %183 : vector<8x32xf32>
    %186 = arith.divf %184, %185 : vector<8x32xf32>
    %187 = vector.extract_strided_slice %180 {offsets = [0, 32], sizes = [8, 32], strides = [1, 1]} : vector<8x128xf32> to vector<8x32xf32>
    %188 = arith.negf %187 : vector<8x32xf32>
    %189 = math.exp %188 : vector<8x32xf32>
    %cst_51 = arith.constant 1.000000e+00 : f32
    %190 = vector.broadcast %cst_51 : f32 to vector<8x32xf32>
    %191 = arith.addf %190, %189 : vector<8x32xf32>
    %192 = arith.divf %190, %191 : vector<8x32xf32>
    %193 = vector.extract_strided_slice %180 {offsets = [0, 64], sizes = [8, 32], strides = [1, 1]} : vector<8x128xf32> to vector<8x32xf32>
    %194 = math.tanh %193 : vector<8x32xf32>
    %195 = vector.extract_strided_slice %180 {offsets = [0, 96], sizes = [8, 32], strides = [1, 1]} : vector<8x128xf32> to vector<8x32xf32>
    %196 = arith.negf %195 : vector<8x32xf32>
    %197 = math.exp %196 : vector<8x32xf32>
    %cst_52 = arith.constant 1.000000e+00 : f32
    %198 = vector.broadcast %cst_52 : f32 to vector<8x32xf32>
    %199 = arith.addf %198, %197 : vector<8x32xf32>
    %200 = arith.divf %198, %199 : vector<8x32xf32>
    %201 = arith.mulf %192, %170 : vector<8x32xf32>
    %202 = arith.mulf %186, %194 : vector<8x32xf32>
    %203 = arith.addf %201, %202 : vector<8x32xf32>
    %204 = math.tanh %203 : vector<8x32xf32>
    %205 = arith.mulf %200, %204 : vector<8x32xf32>
    %206 = arith.index_cast %176 : i32 to index
    %c0_53 = arith.constant 0 : index
    %207 = vector.load %arg12[%206, %c0_53] : memref<64x32xf32, #tpu.memory_space<vmem>>, vector<8x32xf32>
    tpu.vector_store %arg12[%206, %c0_53], %205 {strides = array<i32>} : memref<64x32xf32, #tpu.memory_space<vmem>>, vector<8x32xf32>,
    %c6_i32 = arith.constant 6 : i32
    %c8_i32_54 = arith.constant 8 : i32
    %208 = arith.muli %c6_i32, %c8_i32_54 : i32
    %209 = tpu.assume_multiple %208, 8 : i32
    %210 = arith.index_cast %209 : i32 to index
    %c0_55 = arith.constant 0 : index
    %211 = vector.load %arg11[%210, %c0_55] : memref<64x128xf32, #tpu.memory_space<vmem>>, vector<8x128xf32>
    %cst_56 = arith.constant dense<0.000000e+00> : vector<8x128xf32>
    %212 = tpu.matmul %205, %7, %cst_56 {dimension_numbers = #tpu.dot_dimension_numbers<[1], [0], [0], [1], [0, 0, 1, 1], [], []>} : vector<8x32xf32>, vector<32x128xf32>, vector<8x128xf32> -> vector<8x128xf32>
    %213 = arith.addf %211, %212 : vector<8x128xf32>
    %214 = vector.extract_strided_slice %213 {offsets = [0, 0], sizes = [8, 32], strides = [1, 1]} : vector<8x128xf32> to vector<8x32xf32>
    %215 = arith.negf %214 : vector<8x32xf32>
    %216 = math.exp %215 : vector<8x32xf32>
    %cst_57 = arith.constant 1.000000e+00 : f32
    %217 = vector.broadcast %cst_57 : f32 to vector<8x32xf32>
    %218 = arith.addf %217, %216 : vector<8x32xf32>
    %219 = arith.divf %217, %218 : vector<8x32xf32>
    %220 = vector.extract_strided_slice %213 {offsets = [0, 32], sizes = [8, 32], strides = [1, 1]} : vector<8x128xf32> to vector<8x32xf32>
    %221 = arith.negf %220 : vector<8x32xf32>
    %222 = math.exp %221 : vector<8x32xf32>
    %cst_58 = arith.constant 1.000000e+00 : f32
    %223 = vector.broadcast %cst_58 : f32 to vector<8x32xf32>
    %224 = arith.addf %223, %222 : vector<8x32xf32>
    %225 = arith.divf %223, %224 : vector<8x32xf32>
    %226 = vector.extract_strided_slice %213 {offsets = [0, 64], sizes = [8, 32], strides = [1, 1]} : vector<8x128xf32> to vector<8x32xf32>
    %227 = math.tanh %226 : vector<8x32xf32>
    %228 = vector.extract_strided_slice %213 {offsets = [0, 96], sizes = [8, 32], strides = [1, 1]} : vector<8x128xf32> to vector<8x32xf32>
    %229 = arith.negf %228 : vector<8x32xf32>
    %230 = math.exp %229 : vector<8x32xf32>
    %cst_59 = arith.constant 1.000000e+00 : f32
    %231 = vector.broadcast %cst_59 : f32 to vector<8x32xf32>
    %232 = arith.addf %231, %230 : vector<8x32xf32>
    %233 = arith.divf %231, %232 : vector<8x32xf32>
    %234 = arith.mulf %225, %203 : vector<8x32xf32>
    %235 = arith.mulf %219, %227 : vector<8x32xf32>
    %236 = arith.addf %234, %235 : vector<8x32xf32>
    %237 = math.tanh %236 : vector<8x32xf32>
    %238 = arith.mulf %233, %237 : vector<8x32xf32>
    %239 = arith.index_cast %209 : i32 to index
    %c0_60 = arith.constant 0 : index
    %240 = vector.load %arg12[%239, %c0_60] : memref<64x32xf32, #tpu.memory_space<vmem>>, vector<8x32xf32>
    tpu.vector_store %arg12[%239, %c0_60], %238 {strides = array<i32>} : memref<64x32xf32, #tpu.memory_space<vmem>>, vector<8x32xf32>,
    %c7_i32 = arith.constant 7 : i32
    %c8_i32_61 = arith.constant 8 : i32
    %241 = arith.muli %c7_i32, %c8_i32_61 : i32
    %242 = tpu.assume_multiple %241, 8 : i32
    %243 = arith.index_cast %242 : i32 to index
    %c0_62 = arith.constant 0 : index
    %244 = vector.load %arg11[%243, %c0_62] : memref<64x128xf32, #tpu.memory_space<vmem>>, vector<8x128xf32>
    %cst_63 = arith.constant dense<0.000000e+00> : vector<8x128xf32>
    %245 = tpu.matmul %238, %7, %cst_63 {dimension_numbers = #tpu.dot_dimension_numbers<[1], [0], [0], [1], [0, 0, 1, 1], [], []>} : vector<8x32xf32>, vector<32x128xf32>, vector<8x128xf32> -> vector<8x128xf32>
    %246 = arith.addf %244, %245 : vector<8x128xf32>
    %247 = vector.extract_strided_slice %246 {offsets = [0, 0], sizes = [8, 32], strides = [1, 1]} : vector<8x128xf32> to vector<8x32xf32>
    %248 = arith.negf %247 : vector<8x32xf32>
    %249 = math.exp %248 : vector<8x32xf32>
    %cst_64 = arith.constant 1.000000e+00 : f32
    %250 = vector.broadcast %cst_64 : f32 to vector<8x32xf32>
    %251 = arith.addf %250, %249 : vector<8x32xf32>
    %252 = arith.divf %250, %251 : vector<8x32xf32>
    %253 = vector.extract_strided_slice %246 {offsets = [0, 32], sizes = [8, 32], strides = [1, 1]} : vector<8x128xf32> to vector<8x32xf32>
    %254 = arith.negf %253 : vector<8x32xf32>
    %255 = math.exp %254 : vector<8x32xf32>
    %cst_65 = arith.constant 1.000000e+00 : f32
    %256 = vector.broadcast %cst_65 : f32 to vector<8x32xf32>
    %257 = arith.addf %256, %255 : vector<8x32xf32>
    %258 = arith.divf %256, %257 : vector<8x32xf32>
    %259 = vector.extract_strided_slice %246 {offsets = [0, 64], sizes = [8, 32], strides = [1, 1]} : vector<8x128xf32> to vector<8x32xf32>
    %260 = math.tanh %259 : vector<8x32xf32>
    %261 = vector.extract_strided_slice %246 {offsets = [0, 96], sizes = [8, 32], strides = [1, 1]} : vector<8x128xf32> to vector<8x32xf32>
    %262 = arith.negf %261 : vector<8x32xf32>
    %263 = math.exp %262 : vector<8x32xf32>
    %cst_66 = arith.constant 1.000000e+00 : f32
    %264 = vector.broadcast %cst_66 : f32 to vector<8x32xf32>
    %265 = arith.addf %264, %263 : vector<8x32xf32>
    %266 = arith.divf %264, %265 : vector<8x32xf32>
    %267 = arith.mulf %258, %236 : vector<8x32xf32>
    %268 = arith.mulf %252, %260 : vector<8x32xf32>
    %269 = arith.addf %267, %268 : vector<8x32xf32>
    %270 = math.tanh %269 : vector<8x32xf32>
    %271 = arith.mulf %266, %270 : vector<8x32xf32>
    %272 = arith.index_cast %242 : i32 to index
    %c0_67 = arith.constant 0 : index
    %273 = vector.load %arg12[%272, %c0_67] : memref<64x32xf32, #tpu.memory_space<vmem>>, vector<8x32xf32>
    tpu.vector_store %arg12[%272, %c0_67], %271 {strides = array<i32>} : memref<64x32xf32, #tpu.memory_space<vmem>>, vector<8x32xf32>,
    %c8_i32_68 = arith.constant 8 : i32
    %c0_69 = arith.constant 0 : index
    %c0_70 = arith.constant 0 : index
    %274 = vector.load %arg9[%c0_69, %c0_70] : memref<8x32xf32, #tpu.memory_space<vmem>>, vector<8x32xf32>
    tpu.vector_store %arg9[%c0_69, %c0_70], %271 {strides = array<i32>} : memref<8x32xf32, #tpu.memory_space<vmem>>, vector<8x32xf32>,
    %c0_71 = arith.constant 0 : index
    %c0_72 = arith.constant 0 : index
    %275 = vector.load %arg10[%c0_71, %c0_72] : memref<8x32xf32, #tpu.memory_space<vmem>>, vector<8x32xf32>
    tpu.vector_store %arg10[%c0_71, %c0_72], %269 {strides = array<i32>} : memref<8x32xf32, #tpu.memory_space<vmem>>, vector<8x32xf32>,
    %c0_73 = arith.constant 0 : index
    %c0_74 = arith.constant 0 : index
    %276 = vector.load %arg12[%c0_73, %c0_74] : memref<64x32xf32, #tpu.memory_space<vmem>>, vector<64x32xf32>
    %c0_75 = arith.constant 0 : index
    %c0_76 = arith.constant 0 : index
    %277 = vector.load %arg6[%c0_75, %c0_76] : memref<32x4xf32, #tpu.memory_space<vmem>>, vector<32x4xf32>
    %cst_77 = arith.constant dense<0.000000e+00> : vector<64x4xf32>
    %278 = tpu.matmul %276, %277, %cst_77 {dimension_numbers = #tpu.dot_dimension_numbers<[1], [0], [0], [1], [0, 0, 1, 1], [], []>} : vector<64x32xf32>, vector<32x4xf32>, vector<64x4xf32> -> vector<64x4xf32>
    %c0_78 = arith.constant 0 : index
    %c0_79 = arith.constant 0 : index
    %279 = vector.load %arg7[%c0_78, %c0_79] : memref<1x4xf32, #tpu.memory_space<vmem>>, vector<1x4xf32>
    %280 = vector.broadcast %279 : vector<1x4xf32> to vector<64x4xf32>
    %281 = arith.addf %278, %280 : vector<64x4xf32>
    %c0_80 = arith.constant 0 : index
    %c0_81 = arith.constant 0 : index
    %282 = vector.load %arg8[%c0_80, %c0_81] : memref<64x4xf32, #tpu.memory_space<vmem>>, vector<64x4xf32>
    tpu.vector_store %arg8[%c0_80, %c0_81], %281 {strides = array<i32>} : memref<64x4xf32, #tpu.memory_space<vmem>>, vector<64x4xf32>,
    return
  }
}

</mosaic_0001>

<bundles_post_ra>
// kernel: tpu_custom_call.1
= control target key start
LH: loop header
LB: loop body
LE: loop exit
PB: predicated region body
PF: predicated region fallthrough
CT: control target
= control target key end

     0   :  { %16 = vsyncpa [#allocation5], 0  ;;  %vm75_vm0 = vcmask 1043456   ;;  %vm50_vm1 = vcmask 31744   ;;  %v1632_v8 = vmov 0.0|0.0   ;;  %s1973_s0 = inlined_call_operand.vmem [shape: f32[64,4], index: 0, kind: input, shape index: {}]   ;;  %s1974_s1 = inlined_call_operand.vmem [shape: f32[8,32], index: 1, kind: input, shape index: {}]   ;;  %s1975_s2 = inlined_call_operand.vmem [shape: f32[8,32], index: 2, kind: input, shape index: {}]   ;;  %s1976_s3 = inlined_call_operand.vmem [shape: f32[4,128], index: 3, kind: input, shape index: {}]   ;;  %s1977_s4 = inlined_call_operand.vmem [shape: f32[32,128], index: 4, kind: input, shape index: {}]   ;;  %s1978_s5 = inlined_call_operand.vmem [shape: f32[1,128], index: 5, kind: input, shape index: {}]   ;;  %s1979_s6 = inlined_call_operand.vmem [shape: f32[32,4], index: 6, kind: input, shape index: {}]   ;;  %s1980_s7 = inlined_call_operand.vmem [shape: f32[1,4], index: 7, kind: input, shape index: {}]   ;;  %s1981_s8 = inlined_call_operand.vmem [shape: f32[64,4], index: 8, kind: output, shape index: {0}]   ;;  %s1982_s9 = inlined_call_operand.hbm [shape: f32[8,32], index: 9, kind: output, shape index: {1}]   ;;  %s1983_s10 = inlined_call_operand.hbm [shape: f32[8,32], index: 10, kind: output, shape index: {2}]  }
   0x1   :  { %v42_v0 = vld [vmem:[%s1976_s3] sm:$0xf]  ;;  %v39_v2 = vld [vmem:[%s1973_s0 + $0x28] sm:$0xff]  ;;  %v40_v5 = vld [vmem:[%s1973_s0 + $0x30] sm:$0xff] }
   0x2   :  { %v38_v1 = vld [vmem:[%s1973_s0 + $0x20] sm:$0xff]  ;;  %1510 = vmatprep.subr.msk.mxu1 %vm75_vm0, %v42_v0  ;;  %v193_v4 = vld [vmem:[%s1977_s4 + $0x8] sm:$0xff]  ;;  %1332 = vmatprep.subr.msk.mxu0 %vm75_vm0, %v42_v0  ;;  %v194_v10 = vld [vmem:[%s1977_s4 + $0x10] sm:$0xff] }
   0x3   :  { %1340 = vmatprep.mubr.msk.f32.mxu1 %vm50_vm1, %v38_v1  ;;  %v192_v3 = vld [vmem:[%s1977_s4] sm:$0xff]  ;;  %1511 = vmatpush3.msk.msra.mxu1 %vm75_vm0, %v42_v0  ;;  %v35_v9 = vld [vmem:[%s1973_s0 + $0x8] sm:$0xff]  ;;  %v195_v11 = vld [vmem:[%s1977_s4 + $0x18] sm:$0xff] }
   0x4   :  { %v1716_v6 = vpack.c.bf16 %v193_v4, %v192_v3  ;;  %v34_v7 = vld [vmem:[%s1973_s0] sm:$0xff]  ;;  %1341 = vmatmul.mubr.msk.f32.vlgmr.msra.gmra.mrb[0].mxu1 %vm50_vm1, %v39_v2  ;;  %1454 = vmatprep.subr.bf16.mxu1 %v1632_v8  ;;  %v41_v12 = vld [vmem:[%s1973_s0 + $0x38] sm:$0xff]  ;;  %v1738_v13 = vpack.c.bf16 %v195_v11, %v194_v10 }
   0x5   :  { %1343 = vmatprep.mubr.msk.f32.mxu1 %vm50_vm1, %v40_v5 }
   0x6   :  { %1456 = vmatpush3.bf16.msra.mxu1 %v1716_v6 }
   0x7   :  { %17 = vsyncpa [#allocation7], 0  ;;  %1333 = vmatpush3.msk.msra.mxu0 %vm75_vm0, %v42_v0  ;;  %1334 = vmatprep.mubr.msk.f32.mxu0 %vm50_vm1, %v34_v7  ;;  %vm1633_vm2 = vmmov 0   ;;  %v1634_v14 = vmov 0.0   ;;  %v196_v15 = vld [vmem:[%s1974_s1] sm:$0xff]  ;;  %vm199_vm3 = vcmask 261120  }
   0x8   :  { %1457 = vmatprep.subr.bf16.mxu1 %v1632_v8  ;;  %1335 = vmatmul.mubr.msk.f32.vlgmr.msra.gmra.mrb[0].mxu0 %vm50_vm1, %v35_v9  ;;  %v1771_v19 = vld [vmem:[%s1978_s5] ss:$0 sm:$0xff]  ;;  %s1635_s16 = smov 64   ;;  %s1636_s5 = smov 32   ;;  %v36_v57 = vld [vmem:[%s1973_s0 + $0x10] sm:$0xff]  ;;  %v37_v58 = vld [vmem:[%s1973_s0 + $0x18] sm:$0xff] }
   0x9   :  { %1344 = vmatmul.mubr.msk.f32.gmra.mrb[2].mxu1 %vm50_vm1, %v41_v12  ;;  %1466 = vmatprep.subr.bf16.mxu0 %v1632_v8  ;;  %v197_v28 = vld [vmem:[%s1975_s2] sm:$0xff]  ;;  %s1637_s2 = smov 96   ;;  %s1638_s19 = smov [#allocation4]  }
   0xa   :  { %1459 = vmatpush3.bf16.msra.mxu1 %v1738_v13  ;;  %1354 = vmatprep.mubr.msk.f32.mxu1 %vm1633_vm2, %v1634_v14  ;;  %s1212_s20 = sshll.u32 %s1638_s19, 4  ;;  %s1213_s20 = int_to_ptr.vmem [resolvable:$true] %s1212_s20 }
   0xb   :  { %1460 = vmatprep.subr.bf16.mxu1 %v1632_v8  ;;  %1468 = vmatpush3.bf16.msra.mxu0 %v1716_v6  ;;  %s1584_s0 = scalar_lea.vmem %s1213_s20, 128  ;;  %p1589_p1 = scmp.lt.s32.totalorder %s1213_s20, %s1213_s20 }
   0xc   :  { %1469 = vmatprep.subr.bf16.mxu0 %v1632_v8  ;;  %1337 = vmatprep.mubr.msk.f32.mxu0 %vm50_vm1, %v36_v57  ;;  %p1585_p0 = scmp.ne.s32.totalorder %s1213_s20, %s1584_s0  ;;  %p1590_p2 = scmp.lt.s32.totalorder %s1584_s0, %s1584_s0 }
   0xd   :  { %1355 = vmatmul.mubr.msk.f32.vlgmr.msra.gmra.mrb[4].mxu1 %vm199_vm3, %v196_v15  ;;  %1338 = vmatmul.mubr.msk.f32.gmra.mrb[2].mxu0 %vm50_vm1, %v37_v58 }
   0xe   :  { %1462 = vmatpush3.bf16.msra.mxu1 %v1716_v6  ;;  %1365 = vmatprep.mubr.msk.f32.mxu1 %vm1633_vm2, %v1634_v14  ;;  %p1591_p3 = por %p1590_p2, %p1589_p1 }
   0xf   :  { %1463 = vmatprep.subr.bf16.mxu1 %v1632_v8  ;;  %1471 = vmatpush3.bf16.msra.mxu0 %v1738_v13 }
  0x10   :  { %1478 = vmatprep.subr.bf16.mxu0 %v1632_v8  ;;  %1376 = vmatprep.mubr.msk.f32.mxu0 %vm1633_vm2, %v1634_v14  ;;  %p1592_p4 = pnand %p1591_p3, %p1585_p0 }
  0x12   :  { %1465 = vmatpush3.bf16.msra.mxu1 %v1738_v13 }
  0x13   :  { %1472 = vmatprep.subr.bf16.mxu1 %v1632_v8 }
  0xd7   :  { %v1764_v16 = vpop.f32.mrb[0].mxu1 }
  0xd8   :  { %v1766_v17 = vpop.f32.mrb[1].mxu1 }
  0xdb   :  { %v1336_v18 = vpop.f32.mrb[0].mxu0 }
  0xdc   :  { %v1773_v20 = vpop.f32.mrb[2].mxu1  ;;  %v145_v21 = vpop.f32.mrb[1].mxu0  ;;  %v151_v43 = vadd.f32 %v1336_v18, %v1771_v19 }
  0xdd   :  { %v1775_v22 = vpop.f32.mrb[3].mxu1  ;;  %v146_v23 = vadd.f32 %v1771_v19, %v145_v21 }
  0xe0   :  { %v269_v24 = vpop.f32.mrb[4].mxu1  ;;  %v1339_v62 = vpop.f32.mrb[2].mxu0 }
  0xe1   :  { %v273_v25 = vadd.f32 %v269_v24, %v146_v23  ;;  %v1356_v26 = vpop.f32.mrb[5].mxu1  ;;  %v155_v63 = vpop.f32.mrb[3].mxu0 }
  0xe2   :  { %v156_v1 = vadd.f32 %v1771_v19, %v155_v63  ;;  %v171_v63 = vadd.f32 %v1764_v16, %v1771_v19 }
  0xe3   :  { %1520 = vtanh.f32 %v273_v25  ;;  %v1247_v29 = vmul.f32 -1.442695, %v273_v25 }
  0xe5   :  { %1522 = vpow2.f32 %v1247_v29 }
  0xed   :  { %v1521_v27 = vpop.eup %1520 }
  0xee   :  { %287 = vrot.lane.b32.xlu0 %v1521_v27, %s1635_s16 }
  0xef   :  { %v1523_v30 = vpop.eup %1522 }
  0xf0   :  { %v277_v31 = vadd.f32 1.0, %v1523_v30 }
  0xf2   :  { %282 = vrot.lane.b32.xlu0 %v197_v28, %s1636_s5  ;;  %1524 = vrcp.f32 %v277_v31  ;;  %v161_v28 = vadd.f32 %v1339_v62, %v1771_v19 }
  0xfc   :  { %v1525_v32 = vpop.eup %1524 }
 0x160   :  { %v288_v33 = vpop.permute.xlu0 %287 }
 0x161   :  { %v290_v34 = vmul.f32 %v1525_v32, %v288_v33 }
 0x163   :  { %292 = vrot.lane.b32.xlu1 %v290_v34, %s1636_s5 }
 0x164   :  { %v283_v35 = vpop.permute.xlu0 %282 }
 0x165   :  { %v285_v36 = vmul.f32 %v1525_v32, %v283_v35 }
 0x1d5   :  { %v293_v37 = vpop.permute.xlu1 %292 }
 0x1d6   :  { %v295_v38 = vadd.f32 %v293_v37, %v285_v36 }
 0x1d8   :  { %1526 = vtanh.f32 %v295_v38 }
 0x1e2   :  { %v1527_v39 = vpop.eup %1526 }
 0x1e3   :  { %298 = vrot.lane.b32.xlu1 %v1527_v39, %s1635_s16 }
 0x255   :  { %v299_v40 = vpop.permute.xlu1 %298 }
 0x256   :  { %v301_v41 = vmul.f32 %v1525_v32, %v299_v40 }
 0x258   :  { %303 = vrot.lane.b32.xlu0 %v301_v41, %s1636_s5 }
 0x2ca   :  { %v304_v42 = vpop.permute.xlu0 %303 }
 0x2cb   :  { %306 = vst.msk [vmem:[#allocation3] sm:$0xff] %vm199_vm3, %v304_v42  ;;  %1366 = vmatmul.mubr.msk.f32.vlgmr.msra.gmra.mrb[6].mxu1 %vm199_vm3, %v304_v42 }
 0x2cc   :  { %1474 = vmatpush3.bf16.msra.mxu1 %v1716_v6  ;;  %1387 = vmatprep.mubr.msk.f32.mxu1 %vm1633_vm2, %v1634_v14 }
 0x2cd   :  { %1475 = vmatprep.subr.bf16.mxu1 %v1632_v8 }
 0x2d0   :  { %1477 = vmatpush3.bf16.msra.mxu1 %v1738_v13 }
 0x2d1   :  { %1484 = vmatprep.subr.bf16.mxu1 %v1632_v8 }
 0x39e   :  { %v377_v44 = vpop.f32.mrb[6].mxu1 }
 0x39f   :  { %v381_v45 = vadd.f32 %v377_v44, %v151_v43  ;;  %v1367_v46 = vpop.f32.mrb[7].mxu1 }
 0x3a0   :  { %v166_v46 = vadd.f32 %v1771_v19, %v1766_v17 }
 0x3a1   :  { %1528 = vtanh.f32 %v381_v45  ;;  %v1249_v48 = vmul.f32 -1.442695, %v381_v45 }
 0x3a3   :  { %1530 = vpow2.f32 %v1249_v48 }
 0x3ab   :  { %v1529_v47 = vpop.eup %1528 }
 0x3ac   :  { %391 = vrot.lane.b32.xlu1 %v1529_v47, %s1635_s16 }
 0x3ad   :  { %v1531_v49 = vpop.eup %1530 }
 0x3ae   :  { %v385_v50 = vadd.f32 1.0, %v1531_v49 }
 0x3b0   :  { %1532 = vrcp.f32 %v385_v50 }
 0x3ba   :  { %v1533_v51 = vpop.eup %1532 }
 0x3bb   :  { %v389_v54 = vmul.f32 %v1533_v51, %v295_v38 }
 0x41e   :  { %v392_v52 = vpop.permute.xlu1 %391 }
 0x41f   :  { %v394_v53 = vmul.f32 %v1533_v51, %v392_v52 }
 0x421   :  { %396 = vrot.lane.b32.xlu0 %v394_v53, %s1636_s5 }
 0x493   :  { %v397_v55 = vpop.permute.xlu0 %396 }
 0x494   :  { %v399_v56 = vadd.f32 %v397_v55, %v389_v54 }
 0x496   :  { %1534 = vtanh.f32 %v399_v56 }
 0x4a0   :  { %v1535_v59 = vpop.eup %1534 }
 0x4a1   :  { %402 = vrot.lane.b32.xlu1 %v1535_v59, %s1635_s16 }
 0x513   :  { %v403_v60 = vpop.permute.xlu1 %402 }
 0x514   :  { %v405_v61 = vmul.f32 %v1533_v51, %v403_v60 }
 0x516   :  { %407 = vrot.lane.b32.xlu0 %v405_v61, %s1636_s5 }
 0x588   :  { %v408_v0 = vpop.permute.xlu0 %407 }
 0x589   :  { %411 = vst.msk [vmem:[#allocation3 + $0x8] sm:$0xff] %vm199_vm3, %v408_v0  ;;  %1377 = vmatmul.mubr.msk.f32.vlgmr.msra.gmra.mrb[4].mxu0 %vm199_vm3, %v408_v0 }
 0x58a   :  { %1480 = vmatpush3.bf16.msra.mxu0 %v1716_v6  ;;  %1398 = vmatprep.mubr.msk.f32.mxu0 %vm1633_vm2, %v1634_v14 }
 0x58b   :  { %1481 = vmatprep.subr.bf16.mxu0 %v1632_v8 }
 0x58e   :  { %1483 = vmatpush3.bf16.msra.mxu0 %v1738_v13 }
 0x58f   :  { %1490 = vmatprep.subr.bf16.mxu0 %v1632_v8 }
 0x65c   :  { %v482_v2 = vpop.f32.mrb[4].mxu0 }
 0x65d   :  { %v486_v3 = vadd.f32 %v482_v2, %v156_v1  ;;  %v1378_v4 = vpop.f32.mrb[5].mxu0 }
 0x65f   :  { %1536 = vtanh.f32 %v486_v3  ;;  %v1251_v7 = vmul.f32 -1.442695, %v486_v3 }
 0x661   :  { %1538 = vpow2.f32 %v1251_v7 }
 0x669   :  { %v1537_v5 = vpop.eup %1536 }
 0x66a   :  { %496 = vrot.lane.b32.xlu1 %v1537_v5, %s1635_s16 }
 0x66b   :  { %v1539_v9 = vpop.eup %1538 }
 0x66c   :  { %v490_v10 = vadd.f32 1.0, %v1539_v9 }
 0x66e   :  { %1540 = vrcp.f32 %v490_v10  ;;  %v1056_v10 = vld [vmem:[%s1979_s6] sm:$0xff] }
 0x678   :  { %v1541_v11 = vpop.eup %1540 }
 0x679   :  { %v494_v18 = vmul.f32 %v1541_v11, %v399_v56 }
 0x6dc   :  { %v497_v12 = vpop.permute.xlu1 %496 }
 0x6dd   :  { %v499_v15 = vmul.f32 %v1541_v11, %v497_v12 }
 0x6df   :  { %501 = vrot.lane.b32.xlu0 %v499_v15, %s1636_s5 }
 0x751   :  { %v502_v21 = vpop.permute.xlu0 %501 }
 0x752   :  { %v504_v23 = vadd.f32 %v502_v21, %v494_v18 }
 0x754   :  { %1542 = vtanh.f32 %v504_v23 }
 0x75e   :  { %v1543_v24 = vpop.eup %1542 }
 0x75f   :  { %507 = vrot.lane.b32.xlu1 %v1543_v24, %s1635_s16  ;;  %v1059_v24 = vld [vmem:[%s1979_s6 + $0x18] sm:$0xff] }
 0x7d1   :  { %v508_v25 = vpop.permute.xlu1 %507 }
 0x7d2   :  { %v510_v26 = vmul.f32 %v1541_v11, %v508_v25  ;;  %v1057_v11 = vld [vmem:[%s1979_s6 + $0x8] sm:$0xff] }
 0x7d3   :  { %v1502_v12 = vpack.c.bf16 %v1057_v11, %v1056_v10 }
 0x7d4   :  { %512 = vrot.lane.b32.xlu0 %v510_v26, %s1636_s5 }
 0x846   :  { %v513_v27 = vpop.permute.xlu0 %512 }
 0x847   :  { %516 = vst.msk [vmem:[#allocation3 + $0x10] sm:$0xff] %vm199_vm3, %v513_v27  ;;  %1388 = vmatmul.mubr.msk.f32.vlgmr.msra.gmra.mrb[8].mxu1 %vm199_vm3, %v513_v27  ;;  %v1048_v27 = vld [vmem:[#allocation3] sm:$0xff] }
 0x848   :  { %1486 = vmatpush3.bf16.msra.mxu1 %v1716_v6  ;;  %1409 = vmatprep.mubr.msk.f32.mxu1 %vm1633_vm2, %v1634_v14 }
 0x849   :  { %1487 = vmatprep.subr.bf16.mxu1 %v1632_v8 }
 0x84c   :  { %1489 = vmatpush3.bf16.msra.mxu1 %v1738_v13 }
 0x84d   :  { %1496 = vmatprep.subr.bf16.mxu1 %v1632_v8 }
 0x91a   :  { %v587_v29 = vpop.f32.mrb[8].mxu1 }
 0x91b   :  { %v591_v30 = vadd.f32 %v587_v29, %v161_v28  ;;  %v1389_v31 = vpop.f32.mrb[9].mxu1  ;;  %v1049_v28 = vld [vmem:[#allocation3 + $0x8] sm:$0xff]  ;;  %v1050_v29 = vld [vmem:[#allocation3 + $0x10] sm:$0xff] }
 0x91d   :  { %1544 = vtanh.f32 %v591_v30  ;;  %v1253_v33 = vmul.f32 -1.442695, %v591_v30 }
 0x91f   :  { %1546 = vpow2.f32 %v1253_v33  ;;  %v176_v33 = vadd.f32 %v1771_v19, %v1775_v22 }
 0x927   :  { %v1545_v32 = vpop.eup %1544 }
 0x928   :  { %601 = vrot.lane.b32.xlu1 %v1545_v32, %s1635_s16 }
 0x929   :  { %v1547_v34 = vpop.eup %1546 }
 0x92a   :  { %v595_v35 = vadd.f32 1.0, %v1547_v34 }
 0x92c   :  { %1548 = vrcp.f32 %v595_v35 }
 0x936   :  { %v1549_v36 = vpop.eup %1548 }
 0x937   :  { %v599_v39 = vmul.f32 %v1549_v36, %v504_v23  ;;  %v1058_v23 = vld [vmem:[%s1979_s6 + $0x10] sm:$0xff] }
 0x938   :  { %v1506_v25 = vpack.c.bf16 %v1059_v24, %v1058_v23 }
 0x99a   :  { %v602_v37 = vpop.permute.xlu1 %601 }
 0x99b   :  { %v604_v38 = vmul.f32 %v1549_v36, %v602_v37  ;;  %v1889_v37 = vld [vmem:[%s1980_s7] ss:$0 sm:$0xff] }
 0x99d   :  { %606 = vrot.lane.b32.xlu0 %v604_v38, %s1636_s5 }
 0xa0f   :  { %v607_v40 = vpop.permute.xlu0 %606 }
 0xa10   :  { %v609_v41 = vadd.f32 %v607_v40, %v599_v39 }
 0xa12   :  { %1550 = vtanh.f32 %v609_v41 }
 0xa1c   :  { %v1551_v42 = vpop.eup %1550 }
 0xa1d   :  { %612 = vrot.lane.b32.xlu1 %v1551_v42, %s1635_s16 }
 0xa8f   :  { %v613_v43 = vpop.permute.xlu1 %612 }
 0xa90   :  { %v615_v44 = vmul.f32 %v1549_v36, %v613_v43 }
 0xa92   :  { %617 = vrot.lane.b32.xlu0 %v615_v44, %s1636_s5 }
 0xb04   :  { %v618_v45 = vpop.permute.xlu0 %617 }
 0xb05   :  { %621 = vst.msk [vmem:[#allocation3 + $0x18] sm:$0xff] %vm199_vm3, %v618_v45  ;;  %1399 = vmatmul.mubr.msk.f32.vlgmr.msra.gmra.mrb[6].mxu0 %vm199_vm3, %v618_v45 }
 0xb06   :  { %1492 = vmatpush3.bf16.msra.mxu0 %v1716_v6  ;;  %1420 = vmatprep.mubr.msk.f32.mxu0 %vm1633_vm2, %v1634_v14 }
 0xb07   :  { %1493 = vmatprep.subr.bf16.mxu0 %v1632_v8 }
 0xb0a   :  { %1495 = vmatpush3.bf16.msra.mxu0 %v1738_v13 }
 0xb0b   :  { %1503 = vmatprep.subr.bf16.mxu0 %v1502_v12 }
 0xb0c   :  { %v1051_v30 = vld [vmem:[#allocation3 + $0x18] sm:$0xff] }
 0xbd8   :  { %v692_v47 = vpop.f32.mrb[6].mxu0 }
 0xbd9   :  { %v696_v48 = vadd.f32 %v692_v47, %v166_v46  ;;  %v1400_v49 = vpop.f32.mrb[7].mxu0 }
 0xbdb   :  { %1552 = vtanh.f32 %v696_v48  ;;  %v1255_v51 = vmul.f32 -1.442695, %v696_v48 }
 0xbdd   :  { %1554 = vpow2.f32 %v1255_v51 }
 0xbe5   :  { %v1553_v50 = vpop.eup %1552 }
 0xbe6   :  { %706 = vrot.lane.b32.xlu1 %v1553_v50, %s1635_s16 }
 0xbe7   :  { %v1555_v52 = vpop.eup %1554 }
 0xbe8   :  { %v700_v53 = vadd.f32 1.0, %v1555_v52 }
 0xbea   :  { %1556 = vrcp.f32 %v700_v53 }
 0xbf4   :  { %v1557_v54 = vpop.eup %1556 }
 0xbf5   :  { %v704_v57 = vmul.f32 %v1557_v54, %v609_v41 }
 0xc58   :  { %v707_v55 = vpop.permute.xlu1 %706 }
 0xc59   :  { %v709_v56 = vmul.f32 %v1557_v54, %v707_v55 }
 0xc5b   :  { %711 = vrot.lane.b32.xlu0 %v709_v56, %s1636_s5 }
 0xccd   :  { %v712_v58 = vpop.permute.xlu0 %711 }
 0xcce   :  { %v714_v17 = vadd.f32 %v712_v58, %v704_v57 }
 0xcd0   :  { %1558 = vtanh.f32 %v714_v17 }
 0xcda   :  { %v1559_v59 = vpop.eup %1558 }
 0xcdb   :  { %717 = vrot.lane.b32.xlu1 %v1559_v59, %s1635_s16 }
 0xd4d   :  { %v718_v60 = vpop.permute.xlu1 %717 }
 0xd4e   :  { %v720_v61 = vmul.f32 %v1557_v54, %v718_v60 }
 0xd50   :  { %722 = vrot.lane.b32.xlu0 %v720_v61, %s1636_s5 }
 0xdc2   :  { %v723_v62 = vpop.permute.xlu0 %722 }
 0xdc3   :  { %726 = vst.msk [vmem:[#allocation3 + $0x20] sm:$0xff] %vm199_vm3, %v723_v62  ;;  %1410 = vmatmul.mubr.msk.f32.vlgmr.msra.gmra.mrb[10].mxu1 %vm199_vm3, %v723_v62 }
 0xdc4   :  { %1498 = vmatpush3.bf16.msra.mxu1 %v1716_v6  ;;  %1431 = vmatprep.mubr.msk.f32.mxu1 %vm1633_vm2, %v1634_v14 }
 0xdc5   :  { %1499 = vmatprep.subr.bf16.mxu1 %v1632_v8 }
 0xdc8   :  { %1501 = vmatpush3.bf16.msra.mxu1 %v1738_v13 }
 0xdca   :  { %v1052_v31 = vld [vmem:[#allocation3 + $0x20] sm:$0xff] }
 0xe96   :  { %v797_v0 = vpop.f32.mrb[10].mxu1 }
 0xe97   :  { %v801_v1 = vadd.f32 %v797_v0, %v171_v63  ;;  %v1411_v2 = vpop.f32.mrb[11].mxu1  ;;  %v181_v63 = vadd.f32 %v1773_v20, %v1771_v19 }
 0xe99   :  { %1560 = vtanh.f32 %v801_v1  ;;  %v1257_v4 = vmul.f32 -1.442695, %v801_v1 }
 0xe9b   :  { %1562 = vpow2.f32 %v1257_v4 }
 0xea3   :  { %v1561_v3 = vpop.eup %1560 }
 0xea4   :  { %811 = vrot.lane.b32.xlu1 %v1561_v3, %s1635_s16 }
 0xea5   :  { %v1563_v6 = vpop.eup %1562 }
 0xea6   :  { %v805_v5 = vadd.f32 1.0, %v1563_v6 }
 0xea8   :  { %1564 = vrcp.f32 %v805_v5 }
 0xeb2   :  { %v1565_v14 = vpop.eup %1564 }
 0xeb3   :  { %v809_v13 = vmul.f32 %v1565_v14, %v714_v17 }
 0xf16   :  { %v812_v7 = vpop.permute.xlu1 %811 }
 0xf17   :  { %v814_v8 = vmul.f32 %v1565_v14, %v812_v7 }
 0xf19   :  { %816 = vrot.lane.b32.xlu0 %v814_v8, %s1636_s5 }
 0xf8b   :  { %v817_v9 = vpop.permute.xlu0 %816 }
 0xf8c   :  { %v1859_v16 = vadd.f32 %v817_v9, %v809_v13 }
 0xf8e   :  { %1566 = vtanh.f32 %v1859_v16 }
 0xf98   :  { %v1567_v15 = vpop.eup %1566 }
 0xf99   :  { %822 = vrot.lane.b32.xlu1 %v1567_v15, %s1635_s16 }
0x100b   :  { %v823_v18 = vpop.permute.xlu1 %822 }
0x100c   :  { %v825_v21 = vmul.f32 %v1565_v14, %v823_v18 }
0x100e   :  { %827 = vrot.lane.b32.xlu0 %v825_v21, %s1636_s5 }
0x1080   :  { %v828_v26 = vpop.permute.xlu0 %827 }
0x1081   :  { %831 = vst.msk [vmem:[#allocation3 + $0x28] sm:$0xff] %vm199_vm3, %v828_v26  ;;  %1421 = vmatmul.mubr.msk.f32.vlgmr.msra.gmra.mrb[8].mxu0 %vm199_vm3, %v828_v26 }
0x1082   :  { %1505 = vmatpush3.bf16.msra.mxu0 %v1502_v12  ;;  %1442 = vmatprep.mubr.msk.f32.mxu0 %vm199_vm3, %v1048_v27 }
0x1083   :  { %1507 = vmatprep.subr.bf16.mxu0 %v1506_v25 }
0x1086   :  { %1509 = vmatpush3.bf16.msra.mxu0 %v1506_v25 }
0x1088   :  { %v1053_v32 = vld [vmem:[#allocation3 + $0x28] sm:$0xff] }
0x1089   :  { %1443 = vmatmul.mubr.msk.f32.vlgmr.msra.gmra.mrb[10].mxu0 %vm199_vm3, %v1049_v28 }
0x108a   :  { %1445 = vmatprep.mubr.msk.f32.mxu0 %vm199_vm3, %v1050_v29 }
0x108d   :  { %1446 = vmatmul.mubr.msk.f32.gmra.mrb[12].mxu0 %vm199_vm3, %v1051_v30 }
0x108e   :  { %1448 = vmatprep.mubr.msk.f32.mxu0 %vm199_vm3, %v1052_v31 }
0x1091   :  { %1449 = vmatmul.mubr.msk.f32.gmra.mrb[14].mxu0 %vm199_vm3, %v1053_v32 }
0x1154   :  { %v902_v34 = vpop.f32.mrb[8].mxu0 }
0x1155   :  { %v906_v35 = vadd.f32 %v902_v34, %v176_v33  ;;  %v1422_v36 = vpop.f32.mrb[9].mxu0 }
0x1157   :  { %1568 = vtanh.f32 %v906_v35  ;;  %v1259_v50 = vmul.f32 -1.442695, %v906_v35 }
0x1159   :  { %1570 = vpow2.f32 %v1259_v50 }
0x115c   :  { %v1444_v38 = vpop.f32.mrb[10].mxu0 }
0x115d   :  { %v1163_v39 = vadd.f32 %v1444_v38, %v1889_v37  ;;  %v1157_v40 = vpop.f32.mrb[11].mxu0 }
0x115e   :  { %v1158_v41 = vadd.f32 %v1889_v37, %v1157_v40 }
0x115f   :  { %1197 = vst.msk [vmem:[%s1981_s8 + $0x8] sm:$0xff] %vm50_vm1, %v1163_v39 }
0x1160   :  { %1196 = vst.msk [vmem:[%s1981_s8] sm:$0xff] %vm50_vm1, %v1158_v41  ;;  %v1447_v22 = vpop.f32.mrb[12].mxu0 }
0x1161   :  { %v1569_v42 = vpop.eup %1568  ;;  %v1173_v43 = vadd.f32 %v1447_v22, %v1889_v37  ;;  %v1167_v44 = vpop.f32.mrb[13].mxu0 }
0x1162   :  { %v1168_v45 = vadd.f32 %v1889_v37, %v1167_v44  ;;  %916 = vrot.lane.b32.xlu1 %v1569_v42, %s1635_s16 }
0x1163   :  { %1199 = vst.msk [vmem:[%s1981_s8 + $0x18] sm:$0xff] %vm50_vm1, %v1173_v43  ;;  %v1571_v51 = vpop.eup %1570 }
0x1164   :  { %1198 = vst.msk [vmem:[%s1981_s8 + $0x10] sm:$0xff] %vm50_vm1, %v1168_v45  ;;  %v1450_v46 = vpop.f32.mrb[14].mxu0  ;;  %v910_v52 = vadd.f32 1.0, %v1571_v51 }
0x1165   :  { %v1183_v47 = vadd.f32 %v1450_v46, %v1889_v37  ;;  %v1177_v48 = vpop.f32.mrb[15].mxu0 }
0x1166   :  { %v1178_v49 = vadd.f32 %v1889_v37, %v1177_v48  ;;  %1572 = vrcp.f32 %v910_v52 }
0x1167   :  { %1201 = vst.msk [vmem:[%s1981_s8 + $0x28] sm:$0xff] %vm50_vm1, %v1183_v47 }
0x1168   :  { %1200 = vst.msk [vmem:[%s1981_s8 + $0x20] sm:$0xff] %vm50_vm1, %v1178_v49 }
0x1170   :  { %v1573_v53 = vpop.eup %1572 }
0x1171   :  { %v914_v56 = vmul.f32 %v1573_v53, %v1859_v16 }
0x11d4   :  { %v917_v54 = vpop.permute.xlu1 %916 }
0x11d5   :  { %v919_v55 = vmul.f32 %v1573_v53, %v917_v54 }
0x11d7   :  { %921 = vrot.lane.b32.xlu0 %v919_v55, %s1636_s5 }
0x1249   :  { %v922_v57 = vpop.permute.xlu0 %921 }
0x124a   :  { %v924_v58 = vadd.f32 %v922_v57, %v914_v56 }
0x124c   :  { %1574 = vtanh.f32 %v924_v58 }
0x1256   :  { %v1575_v17 = vpop.eup %1574 }
0x1257   :  { %927 = vrot.lane.b32.xlu1 %v1575_v17, %s1635_s16 }
0x12c9   :  { %v928_v59 = vpop.permute.xlu1 %927 }
0x12ca   :  { %v930_v60 = vmul.f32 %v1573_v53, %v928_v59 }
0x12cc   :  { %932 = vrot.lane.b32.xlu0 %v930_v60, %s1636_s5 }
0x133e   :  { %v933_v61 = vpop.permute.xlu0 %932 }
0x133f   :  { %936 = vst.msk [vmem:[#allocation3 + $0x30] sm:$0xff] %vm199_vm3, %v933_v61  ;;  %1432 = vmatmul.mubr.msk.f32.vlgmr.msra.gmra.mrb[12].mxu1 %vm199_vm3, %v933_v61 }
0x1346   :  { %v1054_v62 = vld [vmem:[#allocation3 + $0x30] sm:$0xff] }
0x1347   :  { %1451 = vmatprep.mubr.msk.f32.mxu0 %vm199_vm3, %v1054_v62 }
0x1412   :  { %v1007_v0 = vpop.f32.mrb[12].mxu1 }
0x1413   :  { %v1011_v1 = vadd.f32 %v1007_v0, %v181_v63  ;;  %v1433_v2 = vpop.f32.mrb[13].mxu1 }
0x1415   :  { %1576 = vtanh.f32 %v1011_v1  ;;  %v1261_v4 = vmul.f32 -1.442695, %v1011_v1 }
0x1417   :  { %1578 = vpow2.f32 %v1261_v4 }
0x141f   :  { %v1577_v3 = vpop.eup %1576 }
0x1420   :  { %1021 = vrot.lane.b32.xlu1 %v1577_v3, %s1635_s16 }
0x1421   :  { %v1579_v6 = vpop.eup %1578 }
0x1422   :  { %v1015_v5 = vadd.f32 1.0, %v1579_v6 }
0x1424   :  { %1580 = vrcp.f32 %v1015_v5 }
0x142e   :  { %v1581_v14 = vpop.eup %1580 }
0x142f   :  { %v1019_v13 = vmul.f32 %v1581_v14, %v924_v58 }
0x1492   :  { %v1022_v7 = vpop.permute.xlu1 %1021 }
0x1493   :  { %v1024_v8 = vmul.f32 %v1581_v14, %v1022_v7 }
0x1495   :  { %1026 = vrot.lane.b32.xlu0 %v1024_v8, %s1636_s5 }
0x1507   :  { %v1027_v9 = vpop.permute.xlu0 %1026 }
0x1508   :  { %v1029_v19 = vadd.f32 %v1027_v9, %v1019_v13 }
0x150a   :  { %1582 = vtanh.f32 %v1029_v19 }
0x1514   :  { %v1583_v20 = vpop.eup %1582 }
0x1515   :  { %1032 = vrot.lane.b32.xlu1 %v1583_v20, %s1635_s16  ;;  %s1639_s16 = smov [#allocation6]  }
0x1516   :  { %s1222_s21 = sshll.u32 %s1639_s16, 4  ;;  %s1223_s21 = int_to_ptr.vmem [resolvable:$true] %s1222_s21 }
0x1519   :  { %1044 = vrot.lane.b32.xlu1 %v1029_v19, %s1637_s2 }
0x1587   :  { %v1033_v16 = vpop.permute.xlu1 %1032 }
0x1588   :  { %v1035_v10 = vmul.f32 %v1581_v14, %v1033_v16 }
0x158a   :  { %1037 = vrot.lane.b32.xlu0 %v1035_v10, %s1636_s5 }
0x158b   :  { %v1045_v11 = vpop.permute.xlu1 %1044 }
0x158c   :  { %1047 = vst.msk [vmem:[#allocation6] sm:$0xff] %vm199_vm3, %v1045_v11 }
0x15fc   :  { %v1038_v12 = vpop.permute.xlu0 %1037 }
0x15fd   :  { %1041 = vst.msk [vmem:[#allocation3 + $0x38] sm:$0xff] %vm199_vm3, %v1038_v12  ;;  %1042 = vst.msk [vmem:[#allocation4] sm:$0xff] %vm199_vm3, %v1038_v12 }
0x1604   :  { %v1055_v15 = vld [vmem:[#allocation3 + $0x38] sm:$0xff] }
0x1605   :  { %1452 = vmatmul.mubr.msk.f32.gmra.mrb[16].mxu0 %vm199_vm3, %v1055_v15 }
0x1606   :  { %1595 = shalt.err (!%p1592_p4)
}
0x1607   :  { %s1596_s22 = scalar_lea.hbm %s1982_s9, 128 }
0x1608   :  { %p1597_p5 = scmp.ne.s32.totalorder %s1982_s9, %s1596_s22  ;;  %p1600_p6 = scmp.lt.u32.totalorder %s1596_s22, %s1982_s9 }
0x160a   :  { %p1602_p7 = pnand %p1600_p6, %p1597_p5 }
0x160c   :  { %1605 = shalt.err (!%p1602_p7)
}
0x160d   :  { %1215 = dma.vmem_to_hbm [thread:$0]  %s1213_s20, 128, %s1982_s9, [#allocation5]  }
0x160e   :  { %s1606_s28 = scalar_lea.vmem %s1223_s21, 128  ;;  %p1611_p9 = scmp.lt.s32.totalorder %s1223_s21, %s1223_s21 }
0x160f   :  { %p1607_p8 = scmp.ne.s32.totalorder %s1223_s21, %s1606_s28  ;;  %p1612_p10 = scmp.lt.s32.totalorder %s1606_s28, %s1606_s28 }
0x1611   :  { %p1613_p11 = por %p1612_p10, %p1611_p9 }
0x1613   :  { %p1614_p12 = pnand %p1613_p11, %p1607_p8 }
0x1615   :  { %1617 = shalt.err (!%p1614_p12)
}
0x1616   :  { %s1618_s11 = scalar_lea.hbm %s1983_s10, 128 }
0x1617   :  { %p1619_p13 = scmp.ne.s32.totalorder %s1983_s10, %s1618_s11  ;;  %p1622_p0 = scmp.lt.u32.totalorder %s1618_s11, %s1983_s10 }
0x1619   :  { %p1624_p1 = pnand %p1622_p0, %p1619_p13 }
0x161b   :  { %1627 = shalt.err (!%p1624_p1)
}
0x161c   :  { %1225 = dma.vmem_to_hbm [thread:$0]  %s1223_s21, 128, %s1983_s10, [#allocation7]  }
0x16d8   :  { %v1453_v18 = vpop.f32.mrb[16].mxu0 }
0x16d9   :  { %v1193_v21 = vadd.f32 %v1453_v18, %v1889_v37  ;;  %v1187_v23 = vpop.f32.mrb[17].mxu0 }
0x16da   :  { %v1188_v24 = vadd.f32 %v1889_v37, %v1187_v23 }
0x16db   :  { %1203 = vst.msk [vmem:[%s1981_s8 + $0x38] sm:$0xff] %vm50_vm1, %v1193_v21 }
0x16dc   :  { %1202 = vst.msk [vmem:[%s1981_s8 + $0x30] sm:$0xff] %vm50_vm1, %v1188_v24 }
0x16dd   :  { %1628 = dma.done.wait [#allocation5], 128  }
0x16de   :  { %1629 = vsyncadd [#allocation5], 4294967168 }
0x16df   :  { %1630 = dma.done.wait [#allocation7], 128  }
0x16e0   :  { %1631 = vsyncadd [#allocation7], 4294967168 }
0x16e1   :  { %1234 = vsyncpa [#allocation5], 1 }
0x16e2   :  { %1235 = vsyncpa [#allocation7], 1 }

</bundles_post_ra>
